<compile_context>
chip_gen: v7x
topology: tpu7x:2x2x1
jax: 0.10.0
libtpu: 0.0.40
codegen_flags: <defaults>
</compile_context>

<pallas_src>
import functools
import math

import jax
import jax.numpy as jnp
from jax.experimental import pallas as pl
from jax.experimental.pallas import tpu as pltpu

_LANE = 128
_SUBLANE = 8


def _round_up(a: int, b: int) -> int:
    return ((a + b - 1) // b) * b


def _perm_matmul_kernel(perm_ref, x_ref, o_ref, *, split_f32: bool):
    """o = x @ perm   (perm is a 0/1 block-diagonal permutation matrix).

    perm_ref: VMEM (Fg, Fg) -- constant index_map, stays resident across grid.
    x_ref:    VMEM (tm, Fg) -- row tile of the flattened input.
    o_ref:    VMEM (tm, Fg) -- o[:, k] = x[:, src(k)].
    """
    p = perm_ref[...]
    x = x_ref[...]
    if split_f32:
        # Exact f32 permutation: split a = a0 + a1 + a2 into three bf16 chunks
        # (nested 8-bit ranges cover the full 24-bit significand), permute
        # each chunk with an exact bf16 one-hot matmul (single value*1 product
        # per output, f32 accumulation), then recombine.  The f32 adds are
        # exact because the chunks occupy disjoint bit ranges of the original
        # significand.  (Caveats: values near f32 max or f32 subnormals are
        # outside bf16 range; fine for ordinary activations.)
        a0 = x.astype(jnp.bfloat16)
        r1 = x - a0.astype(jnp.float32)
        a1 = r1.astype(jnp.bfloat16)
        a2 = (r1 - a1.astype(jnp.float32)).astype(jnp.bfloat16)
        o = jnp.dot(a0, p, preferred_element_type=jnp.float32)
        o = o + jnp.dot(a1, p, preferred_element_type=jnp.float32)
        o = o + jnp.dot(a2, p, preferred_element_type=jnp.float32)
        o_ref[...] = o.astype(o_ref.dtype)
    else:
        # bf16: one exact matmul (x*1 products, f32 accumulation, cast back).
        o_ref[...] = jnp.dot(
            x, p, preferred_element_type=jnp.float32).astype(o_ref.dtype)


def positional_sorting_forward(x, position_embedding, *,
                               vmem_tile_budget_bytes=16 * 1024 * 1024,
                               vmem_limit_bytes=32 * 1024 * 1024,
                               min_pallas_bytes=1 << 20,
                               max_perm_dim=1024):
    """Pallas implementation of PositionalSortingLayer.forward.

    x:                  (..., F)  (typically (N, C, T, F)), f32 or bf16
    position_embedding: (F,)
    returns (sorted_features with x's shape/dtype, sorted_indices (F,) int32)
    """
    *lead, F = x.shape
    assert position_embedding.shape == (F,)

    # TODO(synk): argsort of the tiny (F,) parameter has no clean Pallas TPU
    # sort primitive and is not the hot path; it stays in plain JAX.  NB:
    # tie-breaking / NaN ordering may differ from torch.argsort(descending=True).
    sorted_indices = jnp.argsort(-position_embedding).astype(jnp.int32)

    M = math.prod(lead) if lead else 1
    itemsize = jnp.dtype(x.dtype).itemsize

    # Lane packing: when F | 128, pack g rows into one 128-lane row (free,
    # contiguous reshape) so every vreg load/store is fully lane-dense.
    if F > 0 and 128 % F == 0 and M % (128 // F) == 0:
        g = 128 // F
    else:
        g = 1
    Fg = g * F
    M_eff = M // g

    use_pallas = (
        x.dtype in (jnp.float32, jnp.bfloat16)
        and F > 0
        and Fg <= max_perm_dim
        and x.size * itemsize >= min_pallas_bytes
    )
    if not use_pallas:
        # TODO(synk): non-float dtypes, very large F, or tiny inputs fall back
        # to XLA's fused gather (dispatch overhead / perm-matrix size dominate).
        return jnp.take(x, sorted_indices, axis=-1), sorted_indices

    split_f32 = (x.dtype == jnp.float32)
    compute_dtype = jnp.bfloat16 if split_f32 else x.dtype

    # One-hot permutation matrix: W[j, k] = 1 iff j == sorted_indices[k]
    #   => (x @ W)[:, k] = x[:, sorted_indices[k]]   (exact: entries are 0/1).
    # NB: like any matmul-gather, non-finite values in *other* feature columns
    # would leak NaN via 0*inf; use the jnp.take fallback if that matters.
    W = (jnp.arange(F, dtype=jnp.int32)[:, None] == sorted_indices[None, :])
    W = W.astype(jnp.float32)
    if g > 1:
        W = jnp.kron(jnp.eye(g, dtype=jnp.float32), W)   # block-diagonal
    perm = W.astype(compute_dtype)

    x2 = x.reshape(M_eff, Fg)          # contiguous reshape: no HBM copy

    # Row-tile size: largest multiple of 8 whose double-buffered (in + out)
    # VMEM footprint fits the budget; keep >= 2 grid steps when possible so
    # both v7x TensorCores get work.
    lane_pad = _round_up(Fg, _LANE)
    bytes_per_row = 2 * 2 * lane_pad * itemsize          # (in+out) x 2 buffers
    tm_cap = max(_SUBLANE,
                 (vmem_tile_budget_bytes // bytes_per_row) // _SUBLANE * _SUBLANE)
    if M_eff >= 2 * _SUBLANE:
        tm = min(tm_cap, _round_up(pl.cdiv(M_eff, 2), _SUBLANE))
    else:
        tm = M_eff                                       # single full-dim block
    grid = (pl.cdiv(M_eff, tm),)

    n_passes = 3 if split_f32 else 1
    out2 = pl.pallas_call(
        functools.partial(_perm_matmul_kernel, split_f32=split_f32),
        out_shape=jax.ShapeDtypeStruct((M_eff, Fg), x.dtype),
        grid=grid,
        in_specs=[
            pl.BlockSpec((Fg, Fg), lambda i: (0, 0)),    # VMEM-resident perm
            pl.BlockSpec((tm, Fg), lambda i: (i, 0)),
        ],
        out_specs=pl.BlockSpec((tm, Fg), lambda i: (i, 0)),
        compiler_params=pltpu.CompilerParams(
            dimension_semantics=("parallel",),
            vmem_limit_bytes=vmem_limit_bytes,
        ),
        cost_estimate=pl.CostEstimate(
            flops=2 * M_eff * Fg * Fg * n_passes,
            transcendentals=0,
            bytes_accessed=2 * M_eff * Fg * itemsize
                           + Fg * Fg * jnp.dtype(compute_dtype).itemsize,
        ),
    )(perm, x2)

    return out2.reshape(x.shape), sorted_indices


if __name__ == "__main__":
    key = jax.random.PRNGKey(0)
    k_pe, k_x = jax.random.split(key)

    # Small shapes consistent with the module: (N, C, T, F).
    N, C, T, F = 2, 4, 16, 16
    position_embedding = jax.random.normal(k_pe, (F,), dtype=jnp.float32)
    x = jax.random.normal(k_x, (N, C, T, F), dtype=jnp.float32)

    # Force the Pallas path even at toy sizes (the default routes tiny inputs
    # to the jnp.take fallback).
    fwd = functools.partial(positional_sorting_forward, min_pallas_bytes=0)

    # 1) f32, lane-packed path (F | 128): exact 3x bf16 split matmul.
    feats, idx = fwd(x, position_embedding)
    feats = jax.block_until_ready(feats)
    idx = jax.block_until_ready(idx)
    ref_idx = jnp.argsort(-position_embedding).astype(jnp.int32)
    ref = jnp.take(x, ref_idx, axis=-1)
    assert feats.shape == x.shape and feats.dtype == x.dtype
    assert jnp.array_equal(idx, ref_idx), "sorted_indices mismatch"
    assert jnp.array_equal(feats, ref), "f32 packed path mismatch vs gather"

    # 2) bf16 input, same layout, single exact bf16 matmul.
    xb = x.astype(jnp.bfloat16)
    feats_b, idx_b = fwd(xb, position_embedding)
    feats_b = jax.block_until_ready(feats_b)
    assert feats_b.dtype == jnp.bfloat16
    assert jnp.array_equal(feats_b, jnp.take(xb, idx_b, axis=-1)), "bf16 mismatch"

    # 3) F that does not divide 128 (general (tm, F)-block path).
    F2 = 24
    pe2 = jax.random.normal(jax.random.PRNGKey(1), (F2,), dtype=jnp.float32)
    x3 = jax.random.normal(jax.random.PRNGKey(2), (2, 3, 24, F2), dtype=jnp.float32)
    feats3, idx3 = fwd(x3, pe2)
    feats3 = jax.block_until_ready(feats3)
    assert jnp.array_equal(feats3, jnp.take(x3, idx3, axis=-1)), "general path mismatch"

    print("KERNEL_OK")
</pallas_src>

<mosaic_0001>
module attributes {stable_mosaic.version = 11 : i64} {
  func.func @_perm_matmul_kernel(%arg0: i32, %arg1: memref<128x128xbf16, #tpu.memory_space<vmem>>, %arg2: memref<8x128xf32, #tpu.memory_space<vmem>>, %arg3: memref<8x128xf32, #tpu.memory_space<vmem>>) attributes {dimension_semantics = [#tpu.dimension_semantics<parallel>], iteration_bounds = array<i64: 2>, scalar_prefetch = 0 : i64, scratch_operands = 0 : i64, tpu.core_type = #tpu.core_type<tc>, window_params = [{pipeline_mode = #tpu.pipeline_mode<synchronous>, transform_indices = @transform_0, window_bounds = array<i64: 128, 128>}, {transform_indices = @transform_1, window_bounds = array<i64: 8, 128>}, {transform_indices = @transform_2, window_bounds = array<i64: 8, 128>}]} {
    %c0 = arith.constant 0 : index
    %c0_0 = arith.constant 0 : index
    %0 = vector.load %arg1[%c0, %c0_0] : memref<128x128xbf16, #tpu.memory_space<vmem>>, vector<128x128xbf16>
    %c0_1 = arith.constant 0 : index
    %c0_2 = arith.constant 0 : index
    %1 = vector.load %arg2[%c0_1, %c0_2] : memref<8x128xf32, #tpu.memory_space<vmem>>, vector<8x128xf32>
    %2 = arith.truncf %1 : vector<8x128xf32> to vector<8x128xbf16>
    %3 = arith.extf %2 : vector<8x128xbf16> to vector<8x128xf32>
    %4 = arith.subf %1, %3 : vector<8x128xf32>
    %5 = arith.truncf %4 : vector<8x128xf32> to vector<8x128xbf16>
    %6 = arith.extf %5 : vector<8x128xbf16> to vector<8x128xf32>
    %7 = arith.subf %4, %6 : vector<8x128xf32>
    %8 = arith.truncf %7 : vector<8x128xf32> to vector<8x128xbf16>
    %cst = arith.constant dense<0.000000e+00> : vector<8x128xf32>
    %9 = tpu.matmul %2, %0, %cst {dimension_numbers = #tpu.dot_dimension_numbers<[1], [0], [0], [1], [0, 0, 1, 1], [], []>} : vector<8x128xbf16>, vector<128x128xbf16>, vector<8x128xf32> -> vector<8x128xf32>
    %cst_3 = arith.constant dense<0.000000e+00> : vector<8x128xf32>
    %10 = tpu.matmul %5, %0, %cst_3 {dimension_numbers = #tpu.dot_dimension_numbers<[1], [0], [0], [1], [0, 0, 1, 1], [], []>} : vector<8x128xbf16>, vector<128x128xbf16>, vector<8x128xf32> -> vector<8x128xf32>
    %11 = arith.addf %9, %10 : vector<8x128xf32>
    %cst_4 = arith.constant dense<0.000000e+00> : vector<8x128xf32>
    %12 = tpu.matmul %8, %0, %cst_4 {dimension_numbers = #tpu.dot_dimension_numbers<[1], [0], [0], [1], [0, 0, 1, 1], [], []>} : vector<8x128xbf16>, vector<128x128xbf16>, vector<8x128xf32> -> vector<8x128xf32>
    %13 = arith.addf %11, %12 : vector<8x128xf32>
    %c0_5 = arith.constant 0 : index
    %c0_6 = arith.constant 0 : index
    %14 = vector.load %arg3[%c0_5, %c0_6] : memref<8x128xf32, #tpu.memory_space<vmem>>, vector<8x128xf32>
    tpu.vector_store %arg3[%c0_5, %c0_6], %13 {strides = array<i32>} : memref<8x128xf32, #tpu.memory_space<vmem>>, vector<8x128xf32>,
    return
  }
  func.func @transform_0(%arg0: i32) -> (i32, i32) {
    %c0_i32 = arith.constant 0 : i32
    %c0_i32_0 = arith.constant 0 : i32
    %c0_i32_1 = arith.constant 0 : i32
    return %c0_i32, %c0_i32_0 : i32, i32
  }
  func.func @transform_1(%arg0: i32) -> (i32, i32) {
    %c0_i32 = arith.constant 0 : i32
    %c0_i32_0 = arith.constant 0 : i32
    return %arg0, %c0_i32 : i32, i32
  }
  func.func @transform_2(%arg0: i32) -> (i32, i32) {
    %c0_i32 = arith.constant 0 : i32
    %c0_i32_0 = arith.constant 0 : i32
    return %arg0, %c0_i32 : i32, i32
  }
}

</mosaic_0001>

<bundles_post_ra>
// kernel: tpu_custom_call.1
= control target key start
LH: loop header
LB: loop body
LE: loop exit
PB: predicated region body
PF: predicated region fallthrough
CT: control target
= control target key end

     0   :  { %7 = vsyncpa [#allocation3], 0  ;;  %s1033_s0 = inlined_call_operand.hbm [shape: bf16[128,128], index: 0, kind: input, shape index: {}]   ;;  %s1034_s1 = inlined_call_operand.hbm [shape: f32[16,128], index: 1, kind: input, shape index: {}]   ;;  %s1035_s2 = inlined_call_operand.hbm [shape: f32[16,128], index: 2, kind: output, shape index: {}]  }
   0x1   :  { %8 = vsyncpa [#allocation6], 0 }
   0x2   :  { %10 = vsyncpa [#allocation6 + $0x1], 0 }
   0x3   :  { %11 = vsyncpa [#allocation4], 0 }
   0x4   :  { %13 = vsyncpa [#allocation4 + $0x1], 0  ;;  %s800_s9 = smov 0   ;;  %s802_s10 = smov 0  }
   0x5   :  { %s804_s11 = smov 0   ;;  %s806_s12 = smov 0  }
   0x6 LB: > { %s821_s13 = sadd.s32 4294967295, %s776_s12   ;;  %s465_s14 = sadd.s32 4294967294, %s776_s12   ;;  %s776_s12 = sphi %s806_s12, %s1055_s12   ;;  %s772_s11 = sphi %s804_s11, %s1054_s11   ;;  %s768_s10 = sphi %s802_s10, %s1053_s10   ;;  %s764_s9 = sphi %s800_s9, %s1052_s9  }
   0x7   : > { %p60_p0 = scmp.ne.s32.totalorder %s768_s10, %s764_s9  ;;  %p1036_p1 = scmp.eq.s32.totalorder %s821_s13, 0 }
   0x8   : > { %p90_p3 = scmp.eq.s32.totalorder %s465_s14, 1  ;;  %p466_p5 = scmp.ge.s32.totalorder %s776_s12, 1 }
   0x9   : > { %p830_p4 = por %p1036_p1, %p60_p0  ;;  %p97_p7 = scmp.lt.s32.totalorder %s776_s12, 3 }
   0xa   : > { %p835_p6 = por %p90_p3, %p60_p0  ;;  %s778_s18 = smov [#allocation2]  }
   0xb   : > { %s1039_s15 = scalar_select %p830_p4, 1, 0 }
   0xc   : > { %s1040_s16 = scalar_select %p835_p6, 1, 0 }
   0xd   : > { %p840_p8 = pnand %p466_p5, %p97_p7  ;;  %s109_s19 = sshll.u32 %s778_s18, 4  ;;  %s844_s19 = int_to_ptr.vmem [resolvable:$true] %s109_s19 }
   0xe   : > { %s856_s21 = sadd.s32 1, %s776_s12   ;;  %s47_s22 = sadd.s32 1, %s772_s11 }
   0xf   : > { %s1041_s17 = scalar_select %p840_p8, 1, 0 }
  0x10   : > { %p587_p9 = pneg %p840_p8  ;;  %s44_s23 = ssub.s32 %s776_s12, %s856_s21 }
  0x11   : > { %s648_s26 = scalar_lea.hbm %s1033_s0, 1024 }
  0x12   : > { %p851_p11 = pnand %p587_p9, %p1036_p1  ;;  %p649_p12 = scmp.ne.s32.totalorder %s1033_s0, %s648_s26 }
  0x13   : > { %p655_p5 = scmp.lt.u32.totalorder %s648_s26, %s1033_s0 }
  0x14   : > { %p650_p13 = pneg %p851_p11 }
  0x16   : > { %p651_p0 = pnand %p650_p13, %p649_p12 }
  0x18   : > { %p652_p3 = pneg %p651_p0 }
  0x1a   : > { %p657_p7 = pnand %p655_p5, %p652_p3 }
  0x1c   : > { %660 = shalt.err (!%p657_p7)
}
  0x1d   : > { %s661_s3 = scalar_lea.vmem %s844_s19, 1024  ;;  %p669_p2 = scmp.lt.s32.totalorder %s844_s19, %s844_s19 }
  0x1e   : > { %p662_p9 = scmp.ne.s32.totalorder %s844_s19, %s661_s3  ;;  %p670_p6 = scmp.lt.s32.totalorder %s661_s3, %s661_s3 }
  0x20   : > { %p664_p10 = pnand %p662_p9, %p650_p13  ;;  %p671_p4 = por %p670_p6, %p669_p2 }
  0x22   : > { %p665_p1 = pneg %p664_p10 }
  0x24   : > { %p672_p8 = pnand %p671_p4, %p665_p1 }
  0x26   : > { %675 = shalt.err (!%p672_p8)
}
  0x27   : > { %s779_s4 = smov 64   ;;  %s780_s5 = smov 4  }
  0x28   : > { %590 = dma.hbm_to_vmem [thread:$0]  (!%p851_p11), %s1033_s0, 1024, %s844_s19, [#allocation3], %s779_s4, %s779_s4, %s780_s5  }
  0x29   : > { %p45_p2 = scmp.eq.s32.totalorder %s44_s23, 0  ;;  %p54_p1 = scmp.ne.s32.totalorder %s772_s11, %s768_s10 }
  0x2a   : > { %p55_p4 = scmp.eq.s32.totalorder %s776_s12, 0  ;;  %p600_p6 = scmp.lt.s32.totalorder %s776_s12, 2 }
  0x2b   : > { %s887_s8 = scalar_select %p45_p2, %s772_s11, %s47_s22  }
  0x2c   : > { %p56_p8 = por %p55_p4, %p54_p1  ;;  %p1043_p10 = scmp.eq.s32.totalorder %s821_s13, 1 }
  0x2d   : > { %s123_s18 = sand.u32 1, %s772_s11   ;;  %s470_s24 = sshll.u32 %s776_s12, 7 }
  0x2e   : > { %p891_p12 = por %p1043_p10, %p54_p1  ;;  %s469_s25 = sshll.u32 %s123_s18, 3 }
  0x2f   : > { %s900_s27 = scalar_lea.hbm %s1034_s1, %s470_s24  ;;  %s127_s19 = scalar_lea.vmem [#allocation5], %s469_s25 }
  0x30   : > { %s134_s22 = sshll.u32 %s127_s19, 4  ;;  %p902_p11 = pnand %p600_p6, %p56_p8  ;;  %s906_s22 = int_to_ptr.vmem [resolvable:$true] %s134_s22 }
  0x31   : > { %s124_s28 = scalar_lea.sflag [#allocation6], %s123_s18  ;;  %s676_s29 = scalar_lea.hbm %s900_s27, 128 }
  0x32   : > { %p677_p13 = scmp.ne.s32.totalorder %s900_s27, %s676_s29  ;;  %p678_p0 = pneg %p902_p11 }
  0x33   : > { %s681_s4 = scalar_lea.hbm %s1034_s1, 256  ;;  %p682_p7 = scmp.lt.u32.totalorder %s900_s27, %s1034_s1 }
  0x34   : > { %p679_p3 = pnand %p678_p0, %p677_p13  ;;  %p683_p9 = scmp.lt.u32.totalorder %s681_s4, %s676_s29 }
  0x35   : > { %p685_p1 = scmp.lt.u32.totalorder %s676_s29, %s900_s27 }
  0x36   : > { %p680_p5 = pneg %p679_p3  ;;  %p684_p2 = por %p683_p9, %p682_p7 }
  0x38   : > { %p686_p4 = por %p685_p1, %p684_p2 }
  0x3a   : > { %p687_p6 = pnand %p686_p4, %p680_p5 }
  0x3c   : > { %690 = shalt.err (!%p687_p6)
}
  0x3d   : > { %s691_s7 = scalar_lea.vmem %s906_s22, 128  ;;  %s781_s18 = smov [#allocation5]  }
  0x3e   : > { %p692_p8 = scmp.ne.s32.totalorder %s906_s22, %s691_s7  ;;  %s696_s24 = sshll.u32 %s781_s18, 4  ;;  %s697_s24 = int_to_ptr.vmem [resolvable:$false] %s696_s24 }
  0x3f   : > { %s698_s25 = scalar_lea.vmem %s697_s24, 256  ;;  %p699_p3 = scmp.lt.s32.totalorder %s906_s22, %s697_s24 }
  0x40   : > { %p694_p10 = pnand %p692_p8, %p678_p0  ;;  %p700_p7 = scmp.lt.s32.totalorder %s698_s25, %s691_s7 }
  0x42   : > { %p695_p13 = pneg %p694_p10  ;;  %p701_p9 = por %p700_p7, %p699_p3 }
  0x44   : > { %p702_p2 = pnand %p701_p9, %p695_p13 }
  0x46   : > { %705 = shalt.err (!%p702_p2)
}
  0x47   : > { %594 = dma.hbm_to_vmem [thread:$0]  (!%p902_p11), %s900_s27, 128, %s906_s22, %s124_s28  }
  0x48   : > { %p1046_p5 = scmp.ne.s32.totalorder %s1041_s17, 0 }
  0x49   : > { %p1047_p0 = scmp.eq.s32.totalorder (!%p1046_p5), %s821_s13, 0 }
  0x4a   : > { %143 = sbr.rel (%p1046_p5) target bundleno = 380 (0x17c), region = 28 }
  0x51   : > { %751 = dma.done.wait (%p1047_p0), [#allocation3], 1024   ;;  %p1048_p1 = pmov %p1047_p0 }
  0x52   : > { %s940_s20 = sand.u32 1, %s768_s10   ;;  %p1049_p11 = scmp.ne.s32.totalorder %s1039_s15, 0 }
  0x53   : > { %753 = vsyncadd (%p1048_p1), [#allocation3], 4294966272  ;;  %s473_s26 = sshll.u32 %s940_s20, 3  ;;  %s150_s19 = scalar_lea.sflag [#allocation6], %s940_s20 }
  0x54   : > { %s946_s27 = scalar_lea.vmem [#allocation5], %s473_s26 }
  0x55   : > { %755 = dma.done.wait (%p1049_p11), %s150_s19, 128  }
  0x56   : > { %757 = vsyncadd (%p1049_p11), %s150_s19, 4294967168  ;;  %v782_v0 = vmov 0.0   ;;  %vm783_vm0 = vmmov 0   ;;  %v640_v1 = vld [vmem:[#allocation2] sm:$0xff]   ;;  %v641_v2 = vld [vmem:[#allocation2 + $0x8] sm:$0xff]   ;;  %s484_s15 = sshll.u32 %s821_s13, 7 }
  0x57   : > { %534 = vmatprep.subr.bf16.mxu0 %v782_v0  ;;  %514 = vmatprep.subr.bf16.mxu1 %v782_v0  ;;  %v642_v3 = vld [vmem:[#allocation2 + $0x10] sm:$0xff]   ;;  %v643_v4 = vld [vmem:[#allocation2 + $0x18] sm:$0xff]   ;;  %v644_v5 = vld [vmem:[#allocation2 + $0x20] sm:$0xff]   ;;  %s173_s17 = scalar_lea.vmem [#allocation7], %s473_s26  ;;  %s989_s29 = scalar_lea.hbm %s1035_s2, %s484_s15 }
  0x58   : > { %550 = vmatprep.mubr.msk.bf16.mxu0 %vm783_vm0, %v782_v0  ;;  %530 = vmatprep.mubr.msk.bf16.mxu1 %vm783_vm0, %v782_v0  ;;  %v645_v6 = vld [vmem:[#allocation2 + $0x28] sm:$0xff]   ;;  %v646_v9 = vld [vmem:[#allocation2 + $0x30] sm:$0xff]   ;;  %v647_v11 = vld [vmem:[#allocation2 + $0x38] sm:$0xff]   ;;  %s383_s22 = sshll.u32 %s173_s17, 4  ;;  %s370_s13 = scalar_lea.sflag [#allocation4], %s940_s20  ;;  %s991_s22 = int_to_ptr.vmem [resolvable:$true] %s383_s22 }
  0x59   : > { %535 = vmatpush3.bf16.msra.mxu0 %v640_v1  ;;  %515 = vmatpush3.bf16.msra.mxu1 %v640_v1  ;;  %v191_v7 = vld [vmem:[%s946_s27] sm:$0xff]  ;;  %s706_s30 = scalar_lea.vmem %s991_s22, 128  ;;  %s784_s3 = smov [#allocation7]  }
  0x5a   : > { %536 = vmatprep.subr.bf16.mxu0 %v782_v0  ;;  %516 = vmatprep.subr.bf16.mxu1 %v782_v0  ;;  %v192_v8 = vpack.c.bf16 %v191_v7, %v191_v7  ;;  %p707_p4 = scmp.ne.s32.totalorder %s991_s22, %s706_s30  ;;  %s710_s4 = sshll.u32 %s784_s3, 4  ;;  %s711_s4 = int_to_ptr.vmem [resolvable:$false] %s710_s4 }
  0x5b   : > { %s712_s5 = scalar_lea.vmem %s711_s4, 256  ;;  %p713_p10 = scmp.lt.s32.totalorder %s991_s22, %s711_s4 }
  0x5c   : > { %v193_v10 = vunpack.c.l.bf16 %v192_v8  ;;  %p708_p6 = pnand %p707_p4, %p891_p12  ;;  %p714_p13 = scmp.lt.s32.totalorder %s712_s5, %s706_s30 }
  0x5d   : > { %537 = vmatpush3.bf16.msra.mxu0 %v641_v2  ;;  %517 = vmatpush3.bf16.msra.mxu1 %v641_v2 }
  0x5e   : > { %538 = vmatprep.subr.bf16.mxu0 %v782_v0  ;;  %518 = vmatprep.subr.bf16.mxu1 %v782_v0  ;;  %v194_v12 = vsub.f32 %v191_v7, %v193_v10  ;;  %p709_p8 = pneg %p708_p6  ;;  %p715_p3 = por %p714_p13, %p713_p10 }
  0x60   : > { %v195_v13 = vpack.c.bf16 %v194_v12, %v194_v12  ;;  %p716_p7 = pnand %p715_p3, %p709_p8 }
  0x61   : > { %539 = vmatpush3.bf16.msra.mxu0 %v642_v3  ;;  %519 = vmatpush3.bf16.msra.mxu1 %v642_v3 }
  0x62   : > { %540 = vmatprep.subr.bf16.mxu0 %v782_v0  ;;  %520 = vmatprep.subr.bf16.mxu1 %v782_v0  ;;  %v196_v14 = vunpack.c.l.bf16 %v195_v13 }
  0x64   : > { %v197_v15 = vsub.f32 %v194_v12, %v196_v14 }
  0x65   : > { %541 = vmatpush3.bf16.msra.mxu0 %v643_v4  ;;  %521 = vmatpush3.bf16.msra.mxu1 %v643_v4 }
  0x66   : > { %542 = vmatprep.subr.bf16.mxu0 %v782_v0  ;;  %522 = vmatprep.subr.bf16.mxu1 %v782_v0  ;;  %v198_v16 = vpack.c.bf16 %v197_v15, %v197_v15 }
  0x69   : > { %543 = vmatpush3.bf16.msra.mxu0 %v644_v5  ;;  %523 = vmatpush3.bf16.msra.mxu1 %v644_v5 }
  0x6a   : > { %544 = vmatprep.subr.bf16.mxu0 %v782_v0  ;;  %524 = vmatprep.subr.bf16.mxu1 %v782_v0 }
  0x6d   : > { %545 = vmatpush3.bf16.msra.mxu0 %v645_v6  ;;  %525 = vmatpush3.bf16.msra.mxu1 %v645_v6 }
  0x6e   : > { %546 = vmatprep.subr.bf16.mxu0 %v782_v0  ;;  %526 = vmatprep.subr.bf16.mxu1 %v782_v0 }
  0x71   : > { %547 = vmatpush3.bf16.msra.mxu0 %v646_v9  ;;  %527 = vmatpush3.bf16.msra.mxu1 %v646_v9 }
  0x72   : > { %548 = vmatprep.subr.bf16.mxu0 %v782_v0  ;;  %528 = vmatprep.subr.bf16.mxu1 %v782_v0 }
  0x75   : > { %549 = vmatpush3.bf16.msra.mxu0 %v647_v11  ;;  %529 = vmatpush3.bf16.msra.mxu1 %v647_v11 }
  0x76   : > { %554 = vmatprep.subr.bf16.mxu0 %v782_v0 }
  0x78   : > { %551 = vmatmul.mubr.bf16.vlgmr.msra.gmra.mrb[0].mxu0 %v192_v8  ;;  %531 = vmatmul.mubr.bf16.vlgmr.msra.gmra.mrb[0].mxu1 %v195_v13 }
  0x79   : > { %555 = vmatpush3.bf16.msra.mxu0 %v640_v1  ;;  %570 = vmatprep.mubr.msk.bf16.mxu0 %vm783_vm0, %v782_v0 }
  0x7a   : > { %556 = vmatprep.subr.bf16.mxu0 %v782_v0 }
  0x7d   : > { %557 = vmatpush3.bf16.msra.mxu0 %v641_v2 }
  0x7e   : > { %558 = vmatprep.subr.bf16.mxu0 %v782_v0 }
  0x81   : > { %559 = vmatpush3.bf16.msra.mxu0 %v642_v3 }
  0x82   : > { %560 = vmatprep.subr.bf16.mxu0 %v782_v0 }
  0x85   : > { %561 = vmatpush3.bf16.msra.mxu0 %v643_v4 }
  0x86   : > { %562 = vmatprep.subr.bf16.mxu0 %v782_v0 }
  0x89   : > { %563 = vmatpush3.bf16.msra.mxu0 %v644_v5 }
  0x8a   : > { %564 = vmatprep.subr.bf16.mxu0 %v782_v0 }
  0x8d   : > { %565 = vmatpush3.bf16.msra.mxu0 %v645_v6 }
  0x8e   : > { %566 = vmatprep.subr.bf16.mxu0 %v782_v0 }
  0x91   : > { %567 = vmatpush3.bf16.msra.mxu0 %v646_v9 }
  0x92   : > { %568 = vmatprep.subr.bf16.mxu0 %v782_v0 }
  0x95   : > { %569 = vmatpush3.bf16.msra.mxu0 %v647_v11 }
  0x98   : > { %571 = vmatmul.mubr.bf16.vlgmr.msra.gmra.mrb[0].mxu0 %v198_v16 }
 0x14b   : > { %v281_v17 = vpop.f32.mrb[0].mxu1 }
 0x14c   : > { %v532_v18 = vpop.f32.mrb[1].mxu1 }
 0x14d   : > { %v284_v19 = vpop.f32.mrb[2].mxu1 }
 0x14e   : > { %v533_v20 = vpop.f32.mrb[3].mxu1 }
 0x16b   : > { %v361_v21 = vpop.f32.mrb[0].mxu0 }
 0x16c   : > { %v574_v22 = vadd.f32 %v361_v21, %v281_v17  ;;  %v572_v23 = vpop.f32.mrb[1].mxu0 }
 0x16d   : > { %v364_v24 = vpop.f32.mrb[2].mxu0 }
 0x16e   : > { %368 = vst [vmem:[%s173_s17] sm:$0xff] %v574_v22  ;;  %v573_v25 = vpop.f32.mrb[3].mxu0 }
 0x16f   : > { %719 = shalt.err (!%p716_p7)
}
 0x170   : > { %s720_s6 = scalar_lea.hbm %s989_s29, 128  ;;  %s724_s24 = scalar_lea.hbm %s1035_s2, 256 }
 0x171   : > { %p721_p9 = scmp.ne.s32.totalorder %s989_s29, %s720_s6  ;;  %p725_p0 = scmp.lt.u32.totalorder %s989_s29, %s1035_s2 }
 0x172   : > { %p726_p1 = scmp.lt.u32.totalorder %s724_s24, %s720_s6  ;;  %p728_p4 = scmp.lt.u32.totalorder %s720_s6, %s989_s29 }
 0x173   : > { %p722_p2 = pnand %p721_p9, %p891_p12 }
 0x174   : > { %p727_p11 = por %p726_p1, %p725_p0 }
 0x175   : > { %p723_p5 = pneg %p722_p2 }
 0x176   : > { %p729_p6 = por %p728_p4, %p727_p11 }
 0x178   : > { %p730_p8 = pnand %p729_p6, %p723_p5 }
 0x17a   : > { %733 = shalt.err (!%p730_p8)
}
 0x17b   : > { %585 = dma.vmem_to_hbm [thread:$0]  (%p891_p12), %s991_s22, 128, %s989_s29, %s370_s13  }
 0x17c PF: > { %s395_s26 = sand.u32 1, %s764_s9   ;;  %p1050_p10 = scmp.ne.s32.totalorder %s1040_s16, 0 }
 0x17d   : > { %p1051_p13 = scmp.ge.s32.totalorder %s776_s12, 2  ;;  %s396_s19 = scalar_lea.sflag [#allocation4], %s395_s26 }
 0x17f   : > { %p596_p3 = pnand %p1051_p13, %p1050_p10 }
 0x181   : > { %759 = dma.done.wait (!%p596_p3), %s396_s19, 128  }
 0x182   : > { %761 = vsyncadd (!%p596_p3), %s396_s19, 4294967168  ;;  %p16_p7 = scmp.ge.s32.totalorder %s856_s21, 4   ;;  %s1052_s9 = smov %s768_s10 }
 0x183   : > { %s1053_s10 = smov %s772_s11  ;;  %s1054_s11 = smov %s887_s8 }
 0x184   : > { %s1055_s12 = smov %s856_s21  ;;  %18 = sbr.rel (!%p16_p7) target bundleno = 6 (0x6), region = 78 }
 0x18b   :  { %401 = vsyncpa [#allocation3], 1 }
 0x18c   :  { %403 = vsyncpa [#allocation3 + $0x1], 1 }
 0x18d   :  { %404 = vsyncpa [#allocation6], 1 }
 0x18e   :  { %406 = vsyncpa [#allocation6 + $0x1], 1 }
 0x18f   :  { %407 = vsyncpa [#allocation4], 1 }
 0x190   :  { %409 = vsyncpa [#allocation4 + $0x1], 1 }

</bundles_post_ra>
